<compile_context>
chip_gen: v5e
topology: v5e:2x2
jax: 0.10.0
libtpu: 0.0.40
codegen_flags: <defaults>
</compile_context>

<pallas_src>
import functools

import jax
import jax.numpy as jnp
from jax.experimental import pallas as pl
from jax.experimental.pallas import tpu as pltpu


def _moe_gn_kernel(x_ref, g_ref, b_ref, o_ref, *, eps, inv_len):
    # x_ref : (TB, L)  lane-dense rows, one (sample, group) per sublane row
    # g_ref : (TB, L)  f32 per-row gamma (expert-mixed, broadcast over HW)
    # b_ref : (TB, L)  f32 per-row beta
    # o_ref : (TB, L)
    x = x_ref[...].astype(jnp.float32)

    # One-pass statistics per row: var = E[x^2] - mean^2 (f32 accumulation).
    s = jnp.sum(x, axis=-1, keepdims=True)            # (TB, 1)  XLU
    s2 = jnp.sum(x * x, axis=-1, keepdims=True)       # (TB, 1)  XLU
    mean = s * inv_len
    var = jnp.maximum(s2 * inv_len - mean * mean, 0.0)
    inv = jax.lax.rsqrt(var + eps)                     # EUP slot, ~free

    # Normalize then affine: (x - mean) * inv is 2 ops/elem with lane-broadcast
    # scalars; the affine is one mul + one add against the resident row tables.
    xn = (x - mean) * inv
    o_ref[...] = (xn * g_ref[...] + b_ref[...]).astype(o_ref.dtype)


def moe_group_norm(x, expert_weights, weight, bias, num_groups, eps=1e-5):
    """x: (N, C, H, W); expert_weights: (E,); weight/bias: (E, C)."""
    N, C, H, W = x.shape
    G = int(num_groups)
    assert C % G == 0
    Cg = C // G
    HW = H * W
    L = Cg * HW
    rows = N * G

    # ---- hoisted expert mixing (O(E*C), done once in XLA, kept in f32) ----
    ew = expert_weights.astype(jnp.float32)
    mixed_w = jnp.sum(ew[:, None] * weight.astype(jnp.float32), axis=0)  # (C,)
    mixed_b = jnp.sum(ew[:, None] * bias.astype(jnp.float32), axis=0)    # (C,)

    # ---- lane-dense row layout: one (sample, group) per row ---------------
    # (N, C, H, W) -> (N*G, Cg*HW) is a pure contiguous reshape.
    x_rows = x.reshape(rows, L)

    # ---- choose rows-per-step TB -------------------------------------------
    # Constraints: TB is a multiple of G (whole groups per block), sublane
    # legal (multiple of 8 or == rows), and the full pipelined footprint
    #   x-in (2 bufs) + out (2 bufs)          -> 4 * itemsize bytes / element
    #   gamma + beta f32 (2 bufs each)        -> 16 bytes / element
    # fits a conservative budget well inside scoped VMEM on every generation.
    itemsize = jnp.dtype(x.dtype).itemsize
    bytes_per_row = L * (4 * itemsize + 16)
    budget_bytes = 20 * 1024 * 1024
    max_rows_by_mem = max(1, budget_bytes // bytes_per_row)

    cands = sorted({G * k for k in range(1, N + 1) if N % k == 0})
    sub_ok = [t for t in cands if (t % 8 == 0 or t == rows)]  # never empty (t == rows)
    fits = [t for t in sub_ok if t <= max_rows_by_mem]
    # TODO(synk): for very large Cg*H*W, add an inner reduction grid axis with
    # scratch sum/sum_sq accumulators instead of oversizing the row block.
    TB = max(fits) if fits else min(sub_ok)
    num_blocks = rows // TB

    # Per-row gamma/beta for one TB-row block. Rows cycle through groups, so a
    # block starting at a multiple of TB (a multiple of G) sees groups 0..G-1
    # repeating:  gamma_rows[t, c*HW + s] = mixed_w[(t % G)*Cg + c].
    gamma_rows = jnp.tile(jnp.repeat(mixed_w.reshape(G, Cg), HW, axis=1), (TB // G, 1))
    beta_rows = jnp.tile(jnp.repeat(mixed_b.reshape(G, Cg), HW, axis=1), (TB // G, 1))

    vmem_limit = max(32 * 1024 * 1024, TB * bytes_per_row + 4 * 1024 * 1024)

    cost = pl.CostEstimate(
        flops=8 * rows * L,
        transcendentals=rows,
        bytes_accessed=int(2 * rows * L * itemsize + 2 * TB * L * 4),
    )

    out = pl.pallas_call(
        functools.partial(_moe_gn_kernel, eps=float(eps), inv_len=1.0 / float(L)),
        out_shape=jax.ShapeDtypeStruct((rows, L), x.dtype),
        grid_spec=pltpu.PrefetchScalarGridSpec(
            num_scalar_prefetch=0,
            grid=(num_blocks,),
            in_specs=[
                pl.BlockSpec((TB, L), lambda i: (i, 0)),   # x rows (pipelined)
                pl.BlockSpec((TB, L), lambda i: (0, 0)),   # gamma (DMA'd once)
                pl.BlockSpec((TB, L), lambda i: (0, 0)),   # beta  (DMA'd once)
            ],
            out_specs=pl.BlockSpec((TB, L), lambda i: (i, 0)),
        ),
        compiler_params=pltpu.CompilerParams(
            dimension_semantics=("parallel",),
            vmem_limit_bytes=int(vmem_limit),
        ),
        cost_estimate=cost,
    )(x_rows, gamma_rows, beta_rows)

    return out.reshape(N, C, H, W)


def _reference(x, expert_weights, weight, bias, num_groups, eps=1e-5):
    # plain-JAX reference matching torch F.group_norm semantics
    N, C, H, W = x.shape
    G = num_groups
    w = jnp.sum(expert_weights[:, None] * weight, 0)   # (C,)
    b = jnp.sum(expert_weights[:, None] * bias, 0)     # (C,)
    xr = x.reshape(N, G, -1)
    mean = jnp.mean(xr, axis=-1, keepdims=True)
    var = jnp.mean(jnp.square(xr - mean), axis=-1, keepdims=True)
    xn = ((xr - mean) / jnp.sqrt(var + eps)).reshape(N, C, H, W)
    return xn * w[None, :, None, None] + b[None, :, None, None]


if __name__ == "__main__":
    key = jax.random.PRNGKey(0)
    k1, k2, k3, k4 = jax.random.split(key, 4)

    # module config: num_experts=4, num_groups=4, num_channels=8
    E, G, C = 4, 4, 8
    N, H, W = 2, 16, 16

    x = jax.random.normal(k1, (N, C, H, W), dtype=jnp.float32)
    # parameters (module init is ones/zeros; use deterministic random values
    # so the expert mixing is exercised non-trivially)
    weight = 1.0 + 0.1 * jax.random.normal(k2, (E, C), dtype=jnp.float32)
    bias = 0.1 * jax.random.normal(k3, (E, C), dtype=jnp.float32)
    expert_weights = jax.nn.softmax(jax.random.normal(k4, (E,), dtype=jnp.float32))

    out = moe_group_norm(x, expert_weights, weight, bias, num_groups=G, eps=1e-5)
    out = jax.block_until_ready(out)

    ref = _reference(x, expert_weights, weight, bias, num_groups=G, eps=1e-5)
    assert out.shape == (N, C, H, W)
    assert jnp.allclose(out, ref, atol=3e-5, rtol=1e-5), "mismatch vs reference"

    print("KERNEL_OK")
</pallas_src>

<mosaic_0001>
module attributes {stable_mosaic.version = 11 : i64} {
  func.func @_moe_gn_kernel(%arg0: i32, %arg1: memref<8x512xf32, #tpu.memory_space<vmem>>, %arg2: memref<8x512xf32, #tpu.memory_space<vmem>>, %arg3: memref<8x512xf32, #tpu.memory_space<vmem>>, %arg4: memref<8x512xf32, #tpu.memory_space<vmem>>) attributes {dimension_semantics = [#tpu.dimension_semantics<parallel>], iteration_bounds = array<i64: 1>, scalar_prefetch = 0 : i64, scratch_operands = 0 : i64, tpu.core_type = #tpu.core_type<tc>, window_params = [{transform_indices = @transform_0, window_bounds = array<i64: 8, 512>}, {pipeline_mode = #tpu.pipeline_mode<synchronous>, transform_indices = @transform_1, window_bounds = array<i64: 8, 512>}, {pipeline_mode = #tpu.pipeline_mode<synchronous>, transform_indices = @transform_2, window_bounds = array<i64: 8, 512>}, {transform_indices = @transform_3, window_bounds = array<i64: 8, 512>}]} {
    %c0 = arith.constant 0 : index
    %c0_0 = arith.constant 0 : index
    %0 = vector.load %arg1[%c0, %c0_0] : memref<8x512xf32, #tpu.memory_space<vmem>>, vector<8x512xf32>
    %cst = arith.constant dense<0.000000e+00> : vector<8xf32>
    %1 = vector.multi_reduction <add>, %0, %cst [1] : vector<8x512xf32> to vector<8xf32>
    %2 = vector.shape_cast %1 : vector<8xf32> to vector<8x1xf32>
    %3 = arith.mulf %0, %0 : vector<8x512xf32>
    %cst_1 = arith.constant dense<0.000000e+00> : vector<8xf32>
    %4 = vector.multi_reduction <add>, %3, %cst_1 [1] : vector<8x512xf32> to vector<8xf32>
    %5 = vector.shape_cast %4 : vector<8xf32> to vector<8x1xf32>
    %cst_2 = arith.constant 0.001953125 : f32
    %6 = vector.broadcast %cst_2 : f32 to vector<8x1xf32>
    %7 = arith.mulf %2, %6 : vector<8x1xf32>
    %cst_3 = arith.constant 0.001953125 : f32
    %8 = vector.broadcast %cst_3 : f32 to vector<8x1xf32>
    %9 = arith.mulf %5, %8 : vector<8x1xf32>
    %10 = arith.mulf %7, %7 : vector<8x1xf32>
    %11 = arith.subf %9, %10 : vector<8x1xf32>
    %cst_4 = arith.constant 0.000000e+00 : f32
    %12 = vector.broadcast %cst_4 : f32 to vector<8x1xf32>
    %13 = arith.maximumf %11, %12 : vector<8x1xf32>
    %cst_5 = arith.constant 9.99999974E-6 : f32
    %14 = vector.broadcast %cst_5 : f32 to vector<8x1xf32>
    %15 = arith.addf %13, %14 : vector<8x1xf32>
    %16 = math.rsqrt %15 : vector<8x1xf32>
    %17 = vector.broadcast %7 : vector<8x1xf32> to vector<8x512xf32>
    %18 = arith.subf %0, %17 : vector<8x512xf32>
    %19 = vector.broadcast %16 : vector<8x1xf32> to vector<8x512xf32>
    %20 = arith.mulf %18, %19 : vector<8x512xf32>
    %c0_6 = arith.constant 0 : index
    %c0_7 = arith.constant 0 : index
    %21 = vector.load %arg2[%c0_6, %c0_7] : memref<8x512xf32, #tpu.memory_space<vmem>>, vector<8x512xf32>
    %22 = arith.mulf %20, %21 : vector<8x512xf32>
    %c0_8 = arith.constant 0 : index
    %c0_9 = arith.constant 0 : index
    %23 = vector.load %arg3[%c0_8, %c0_9] : memref<8x512xf32, #tpu.memory_space<vmem>>, vector<8x512xf32>
    %24 = arith.addf %22, %23 : vector<8x512xf32>
    %c0_10 = arith.constant 0 : index
    %c0_11 = arith.constant 0 : index
    %25 = vector.load %arg4[%c0_10, %c0_11] : memref<8x512xf32, #tpu.memory_space<vmem>>, vector<8x512xf32>
    tpu.vector_store %arg4[%c0_10, %c0_11], %24 {strides = array<i32>} : memref<8x512xf32, #tpu.memory_space<vmem>>, vector<8x512xf32>,
    return
  }
  func.func @transform_0(%arg0: i32) -> (i32, i32) {
    %c0_i32 = arith.constant 0 : i32
    %c0_i32_0 = arith.constant 0 : i32
    return %arg0, %c0_i32 : i32, i32
  }
  func.func @transform_1(%arg0: i32) -> (i32, i32) {
    %c0_i32 = arith.constant 0 : i32
    %c0_i32_0 = arith.constant 0 : i32
    %c0_i32_1 = arith.constant 0 : i32
    return %c0_i32, %c0_i32_0 : i32, i32
  }
  func.func @transform_2(%arg0: i32) -> (i32, i32) {
    %c0_i32 = arith.constant 0 : i32
    %c0_i32_0 = arith.constant 0 : i32
    %c0_i32_1 = arith.constant 0 : i32
    return %c0_i32, %c0_i32_0 : i32, i32
  }
  func.func @transform_3(%arg0: i32) -> (i32, i32) {
    %c0_i32 = arith.constant 0 : i32
    %c0_i32_0 = arith.constant 0 : i32
    return %arg0, %c0_i32 : i32, i32
  }
}

</mosaic_0001>

<bundles_post_ra>
// kernel: tpu_custom_call.1
= control target key start
LH: loop header
LB: loop body
LE: loop exit
PB: predicated region body
PF: predicated region fallthrough
CT: control target
= control target key end

     0   :  { %8 = vsyncpa [#allocation3], 0  ;;  %s280_s0 = inlined_call_operand.hbm [shape: f32[8,512], index: 0, kind: input, shape index: {}]   ;;  %s281_s1 = inlined_call_operand.hbm [shape: f32[8,512], index: 1, kind: input, shape index: {}]   ;;  %s282_s2 = inlined_call_operand.hbm [shape: f32[8,512], index: 2, kind: input, shape index: {}]   ;;  %s283_s3 = inlined_call_operand.hbm [shape: f32[8,512], index: 3, kind: output, shape index: {}]  }
   0x1   :  { %9 = vsyncpa [#allocation6], 0  ;;  %s27_s14 = sshll.u32 %s281_s1, 4  ;;  %s28_s14 = int_to_ptr.hbm [resolvable:$true] %s27_s14 }
   0x2   :  { %10 = vsyncpa [#allocation4], 0  ;;  %s244_s15 = smov [#allocation5]   ;;  %s16_s19 = sshll.u32 %s280_s0, 4  ;;  %s17_s19 = int_to_ptr.hbm [resolvable:$true] %s16_s19 }
   0x3   :  { %s29_s16 = sshll.u32 %s244_s15, 4  ;;  %s245_s20 = smov [#allocation2]   ;;  %s30_s16 = int_to_ptr.vmem [resolvable:$true] %s29_s16 }
   0x4   :  { %32 = dma.hbm_to_vmem [thread:$0]  %s28_s14, 512, %s30_s16, [#allocation6]  }
   0x5   :  { %s18_s21 = sshll.u32 %s245_s20, 4  ;;  %s38_s24 = sshll.u32 %s282_s2, 4  ;;  %s19_s21 = int_to_ptr.vmem [resolvable:$true] %s18_s21  ;;  %s39_s24 = int_to_ptr.hbm [resolvable:$true] %s38_s24 }
   0x6   :  { %21 = dma.hbm_to_vmem [thread:$0]  %s17_s19, 512, %s19_s21, [#allocation3]  }
   0x7   :  { %s246_s1 = smov [#allocation7]  }
   0x8   :  { %s40_s25 = sshll.u32 %s246_s1, 4  ;;  %s41_s25 = int_to_ptr.vmem [resolvable:$true] %s40_s25 }
   0x9   :  { %43 = dma.hbm_to_vmem [thread:$0]  %s39_s24, 512, %s41_s25, [#allocation6]  }
   0xa   :  { %238 = dma.done.wait [#allocation3], 512  }
   0xb   :  { %239 = vsyncadd [#allocation3], 4294966784 }
   0xc   :  { %240 = dma.done.wait [#allocation6], 1024  }
   0xd   :  { %241 = vsyncadd [#allocation6], 4294966272  ;;  %v56_v0 = vld [vmem:[#allocation2] sm:$0xff]  ;;  %v57_v1 = vld [vmem:[#allocation2 + $0x8] sm:$0xff]  ;;  %s247_s0 = smov [#allocation8]   ;;  %s125_s28 = sshll.u32 %s283_s3, 4  ;;  %s126_s28 = int_to_ptr.hbm [resolvable:$true] %s125_s28 }
   0xe   :  { %v58_v2 = vld [vmem:[#allocation2 + $0x10] sm:$0xff]  ;;  %v60_v3 = vadd.f32 %v57_v1, %v56_v0  ;;  %v65_v4 = vmul.f32 %v56_v0, %v56_v0  ;;  %v66_v5 = vmul.f32 %v57_v1, %v57_v1  ;;  %v59_v6 = vld [vmem:[#allocation2 + $0x18] sm:$0xff]  ;;  %v98_v32 = vld [vmem:[#allocation5] sm:$0xff]  ;;  %s123_s2 = sshll.u32 %s247_s0, 4  ;;  %s124_s2 = int_to_ptr.vmem [resolvable:$true] %s123_s2 }
   0xf   :  { %v67_v8 = vmul.f32 %v58_v2, %v58_v2  ;;  %v68_v11 = vmul.f32 %v59_v6, %v59_v6  ;;  %v99_v34 = vld [vmem:[#allocation5 + $0x8] sm:$0xff]  ;;  %v100_v35 = vld [vmem:[#allocation5 + $0x10] sm:$0xff]  ;;  %v101_v36 = vld [vmem:[#allocation5 + $0x18] sm:$0xff] }
  0x10   :  { %v61_v7 = vadd.f32 %v60_v3, %v58_v2  ;;  %v69_v9 = vadd.f32 %v66_v5, %v65_v4  ;;  %v106_v41 = vld [vmem:[#allocation7] sm:$0xff]  ;;  %v107_v42 = vld [vmem:[#allocation7 + $0x8] sm:$0xff]  ;;  %v108_v43 = vld [vmem:[#allocation7 + $0x10] sm:$0xff] }
  0x11   :  { %v109_v48 = vld [vmem:[#allocation7 + $0x18] sm:$0xff] }
  0x12   :  { %v62_v10 = vadd.f32 %v61_v7, %v59_v6  ;;  %v70_v12 = vadd.f32 %v69_v9, %v67_v8 }
  0x14   :  { %63 = vadd.xlane.f32.xlu0 %v62_v10  ;;  %v71_v13 = vadd.f32 %v70_v12, %v68_v11 }
  0x1c   :  { %72 = vadd.xlane.f32.xlu0 %v71_v13 }
  0x87   :  { %v64_v14 = vpop.xlane.xlu0 %63 }
  0x88   :  { %v74_v15 = vmul.f32 0.001953125, %v64_v14 }
  0x8a   :  { %v76_v17 = vmul.f32 %v74_v15, %v74_v15  ;;  %v90_v28 = vsub.f32 %v56_v0, %v74_v15  ;;  %v91_v29 = vsub.f32 %v57_v1, %v74_v15  ;;  %v92_v30 = vsub.f32 %v58_v2, %v74_v15 }
  0x8b   :  { %v93_v31 = vsub.f32 %v59_v6, %v74_v15 }
  0x8f   :  { %v73_v16 = vpop.xlane.xlu0 %72 }
  0x90   :  { %v75_v18 = vmul.f32 0.001953125, %v73_v16 }
  0x92   :  { %v77_v19 = vsub.f32 %v75_v18, %v76_v17 }
  0x94   :  { %v78_v20 = vmax.f32 %v77_v19, 0.0 }
  0x96   :  { %v79_v21 = vadd.f32 1e-05, %v78_v20 }
  0x98   :  { %140 = vrsqrt.f32 %v79_v21  ;;  %vm86_vm1 = vweird.f32 %v79_v21 }
  0x9e   :  { %v141_v22 = vpop.eup %140 }
  0x9f   :  { %v81_v23 = vmul.f32 %v141_v22, %v79_v21  ;;  %vm87_vm0 = vweird.f32 %v141_v22 }
  0xa0   :  { %vm88_vm2 = vmor %vm86_vm1, %vm87_vm0 }
  0xa1   :  { %v82_v24 = vmul.f32 %v141_v22, %v81_v23 }
  0xa3   :  { %v83_v25 = vmul.f32 0.5, %v82_v24 }
  0xa5   :  { %v84_v26 = vsub.f32 1.5, %v83_v25 }
  0xa7   :  { %v85_v27 = vmul.f32 %v141_v22, %v84_v26 }
  0xa9   :  { %v89_v33 = vsel %vm88_vm2, %v141_v22, %v85_v27 }
  0xaa   :  { %v94_v37 = vmul.f32 %v90_v28, %v89_v33  ;;  %v95_v38 = vmul.f32 %v91_v29, %v89_v33  ;;  %v96_v39 = vmul.f32 %v92_v30, %v89_v33  ;;  %v97_v40 = vmul.f32 %v93_v31, %v89_v33 }
  0xac   :  { %v102_v44 = vmul.f32 %v98_v32, %v94_v37  ;;  %v103_v45 = vmul.f32 %v99_v34, %v95_v38  ;;  %v104_v46 = vmul.f32 %v100_v35, %v96_v39  ;;  %v105_v47 = vmul.f32 %v101_v36, %v97_v40 }
  0xae   :  { %v110_v49 = vadd.f32 %v106_v41, %v102_v44  ;;  %v111_v50 = vadd.f32 %v107_v42, %v103_v45  ;;  %v112_v51 = vadd.f32 %v108_v43, %v104_v46  ;;  %v113_v52 = vadd.f32 %v109_v48, %v105_v47 }
  0xb0   :  { %114 = vst [vmem:[#allocation8] sm:$0xff] %v110_v49 }
  0xb1   :  { %115 = vst [vmem:[#allocation8 + $0x8] sm:$0xff] %v111_v50 }
  0xb2   :  { %116 = vst [vmem:[#allocation8 + $0x10] sm:$0xff] %v112_v51 }
  0xb3   :  { %117 = vst [vmem:[#allocation8 + $0x18] sm:$0xff] %v113_v52 }
  0xb4   :  { %128 = dma.vmem_to_hbm [thread:$0]  %s124_s2, 512, %s126_s28, [#allocation4]  }
  0xb5   :  { %242 = dma.done.wait [#allocation4], 512  }
  0xb6   :  { %243 = vsyncadd [#allocation4], 4294966784 }
  0xb7   :  { %133 = vsyncpa [#allocation3], 1 }
  0xb8   :  { %134 = vsyncpa [#allocation6], 1 }
  0xb9   :  { %135 = vsyncpa [#allocation4], 1 }

</bundles_post_ra>
